<compile_context>
chip_gen: v6e
topology: v6e:2x2x1
jax: 0.10.0
libtpu: 0.0.40
codegen_flags: <defaults>
</compile_context>

<pallas_src>
import functools

import jax
import jax.numpy as jnp
from jax.experimental import pallas as pl
from jax.experimental.pallas import tpu as pltpu


def _round_up(x, m):
    return (x + m - 1) // m * m


def _pad_axis(x, target, axis, value=0.0):
    pad = target - x.shape[axis]
    if pad <= 0:
        return x
    widths = [(0, 0)] * x.ndim
    widths[axis] = (0, pad)
    return jnp.pad(x, widths, constant_values=value)


def ensemble_kernel(emb_ref, feat_ref, mix_ref, w_emb_ref, w_feat_ref, loss_ref,
                    *, top_k, neg_pad, margin):
    # emb_ref:  [TB, top_k, emb_dim]   (f32 or bf16, upcast here; f32 accumulation)
    # feat_ref: [TB, feat_pad]         packed [simi_mean | sub | add | stelp | rot | 1 | 0-pad]
    # mix_ref:  [TB, 2*neg_pad]        packed [neg_s - pos_s | neg_r - pos_r], pads = -1e30
    # w_emb_ref:[1, emb_dim]           Linear weights for the emb_std part
    # w_feat_ref:[1, feat_pad]         Linear weights for the packed score part (+ bias col)
    emb = emb_ref[...].astype(jnp.float32)

    # One-pass unbiased std over the top_k axis: var = (ssq - s^2/n) / (n-1)
    n = float(top_k)
    s = jnp.sum(emb, axis=1)                       # [TB, emb_dim]
    ssq = jnp.sum(emb * emb, axis=1)               # [TB, emb_dim]
    var = jnp.maximum(ssq - s * s * (1.0 / n), 0.0) * (1.0 / (n - 1.0))
    emb_std = jnp.sqrt(var)                        # [TB, emb_dim]

    # Fused linear projection (two lane-dense reductions; bias rides in w_feat's 1-column)
    logit = (jnp.sum(emb_std * w_emb_ref[...], axis=-1, keepdims=True)
             + jnp.sum(feat_ref[...] * w_feat_ref[...], axis=-1, keepdims=True))  # [TB, 1]
    alpha = jax.nn.sigmoid(logit)                  # [TB, 1]

    d_s = mix_ref[:, :neg_pad]                     # [TB, neg_pad]  (neg_stelp - pos_stelp)
    d_r = mix_ref[:, neg_pad:]                     # [TB, neg_pad]  (neg_rotate - pos_rotate)

    # hinge: relu(margin - pos_ens + neg_ens) == relu(margin + a*(ns-ps) + (1-a)*(nr-pr))
    loss_el = jnp.maximum(margin + alpha * d_s + (1.0 - alpha) * d_r, 0.0)
    tile_sum = jnp.sum(loss_el)                    # padded rows/lanes contribute exactly 0

    # Lane/sublane-aligned (8,128) output block: broadcast the per-tile partial sum.
    loss_ref[...] = jnp.zeros_like(loss_ref) + tile_sum


def ensemble_forward(pos_stelp, pos_rotate, ent_idx, neg_stelp, neg_rotate,
                     stelp_scores, rotate_scores, params, *, margin,
                     block_bs=256, emb_dtype=jnp.float32):
    bs, top_k = stelp_scores.shape
    emb_dim = params["ent_emb"].shape[-1]
    neg_times = neg_stelp.shape[-1]

    assert block_bs % 8 == 0
    tb = min(int(block_bs), _round_up(bs, 8))
    bs_pad = _round_up(bs, tb)
    num_tiles = bs_pad // tb

    # --- glue: gathers + lane-dense packing (pure layout / indexing) ---
    # Embedding gather (largest operand). Optional bf16 transfer, f32 accumulate in-kernel.
    emb_g = params["ent_emb"][ent_idx].astype(emb_dtype)        # [bs, top_k, emb_dim]

    # Similarity row means: computed once over the full matrix, then a tiny gather.
    simi_row_mean = jnp.mean(params["simi_mtx"].astype(jnp.float32), axis=-1)  # [num_ents]
    simi_mean = simi_row_mean[ent_idx]                          # [bs, top_k]

    sub = jnp.abs(rotate_scores - stelp_scores)
    add = stelp_scores + rotate_scores
    ones = jnp.ones((bs, 1), jnp.float32)
    feat = jnp.concatenate(
        [simi_mean, sub, add, stelp_scores, rotate_scores, ones], axis=1
    ).astype(jnp.float32)                                       # [bs, 5*top_k + 1]
    feat_pad = _round_up(5 * top_k + 1, 128)
    feat = _pad_axis(feat, feat_pad, axis=1, value=0.0)

    # Linear(5*top_k + emb_dim, 1): weight order matches torch.cat
    # [emb_std, simi_mean, sub, add, stelp, rot]; bias folded into the ones-column.
    W = params["proj_w"].astype(jnp.float32)                    # [1, emb_dim + 5*top_k]
    b = params["proj_b"].astype(jnp.float32).reshape(1, 1)
    w_emb = W[:, :emb_dim]                                      # [1, emb_dim]
    w_feat = jnp.concatenate([W[:, emb_dim:], b], axis=1)       # [1, 5*top_k + 1]
    w_feat = _pad_axis(w_feat, feat_pad, axis=1, value=0.0)

    # Hinge-loss deltas, packed lane-dense; pads poisoned so relu() returns 0.
    NEG_BIG = -1e30
    neg_pad = _round_up(neg_times, 128)
    d_s = _pad_axis((neg_stelp - pos_stelp[:, None]).astype(jnp.float32), neg_pad, 1, NEG_BIG)
    d_r = _pad_axis((neg_rotate - pos_rotate[:, None]).astype(jnp.float32), neg_pad, 1, NEG_BIG)
    mix = jnp.concatenate([d_s, d_r], axis=1)                   # [bs, 2*neg_pad]

    # Batch padding for the grid (padded rows contribute exactly 0 to the loss sum).
    emb_g = _pad_axis(emb_g, bs_pad, axis=0, value=0.0)
    feat = _pad_axis(feat, bs_pad, axis=0, value=0.0)
    mix = _pad_axis(mix, bs_pad, axis=0, value=NEG_BIG)

    kernel = functools.partial(ensemble_kernel, top_k=top_k, neg_pad=neg_pad,
                               margin=float(margin))

    emb_bytes = emb_g.size * jnp.dtype(emb_dtype).itemsize
    cost = pl.CostEstimate(
        flops=int(bs_pad * (3 * top_k * emb_dim + 4 * emb_dim + 2 * feat_pad + 8 * neg_pad)),
        transcendentals=int(bs_pad * (emb_dim + 1)),
        bytes_accessed=int(emb_bytes + 4 * (feat.size + mix.size + w_emb.size + w_feat.size
                                            + num_tiles * 8 * 128)),
    )

    partials = pl.pallas_call(
        kernel,
        out_shape=jax.ShapeDtypeStruct((num_tiles * 8, 128), jnp.float32),
        grid=(num_tiles,),
        in_specs=[
            pl.BlockSpec((tb, top_k, emb_dim), lambda i: (i, 0, 0)),
            pl.BlockSpec((tb, feat_pad), lambda i: (i, 0)),
            pl.BlockSpec((tb, 2 * neg_pad), lambda i: (i, 0)),
            pl.BlockSpec((1, emb_dim), lambda i: (0, 0)),
            pl.BlockSpec((1, feat_pad), lambda i: (0, 0)),
        ],
        out_specs=pl.BlockSpec((8, 128), lambda i: (i, 0)),
        compiler_params=pltpu.CompilerParams(
            dimension_semantics=("parallel",),
            vmem_limit_bytes=32 * 1024 * 1024,
        ),
        cost_estimate=cost,
    )(emb_g, feat, mix, w_emb, w_feat)

    # Each (8,128) block holds its tile's partial sum broadcast; divide by TRUE count.
    loss = jnp.sum(partials[0::8, 0]) / float(bs * neg_times)
    return loss


def ensemble_forward_ref(pos_stelp, pos_rotate, ent_idx, neg_stelp, neg_rotate,
                         stelp_scores, rotate_scores, params, *, margin,
                         emb_dtype=jnp.float32):
    """Pure-JAX reference mirroring the PyTorch forward exactly."""
    emb = params["ent_emb"][ent_idx].astype(emb_dtype).astype(jnp.float32)
    simi = params["simi_mtx"][ent_idx]
    simi_mean = jnp.mean(simi, axis=-1)
    emb_std = jnp.std(emb, axis=1, ddof=1)
    sub = jnp.abs(rotate_scores - stelp_scores)
    add = stelp_scores + rotate_scores
    feat = jnp.concatenate([emb_std, simi_mean, sub, add, stelp_scores, rotate_scores], axis=1)
    alpha = jax.nn.sigmoid(feat @ params["proj_w"].T + params["proj_b"]).squeeze(-1)
    pos_ens = alpha * pos_stelp + (1 - alpha) * pos_rotate
    neg_ens = alpha[:, None] * neg_stelp + (1 - alpha)[:, None] * neg_rotate
    loss = jnp.maximum(margin - pos_ens[:, None] + neg_ens, 0.0)
    return jnp.mean(loss)


if __name__ == "__main__":
    # Small, deterministic synthetic problem (multi-tile grid + padding exercised).
    bs, top_k, emb_dim, neg_times, num_ents = 20, 8, 32, 5, 64
    margin = 0.5
    feat_dim = 5 * top_k + emb_dim

    key = jax.random.PRNGKey(0)
    keys = jax.random.split(key, 10)

    params = {
        "ent_emb": jax.random.normal(keys[0], (num_ents, emb_dim), jnp.float32),
        "simi_mtx": jax.random.uniform(keys[1], (num_ents, num_ents), jnp.float32),
        "proj_w": jax.random.normal(keys[2], (1, feat_dim), jnp.float32) * 0.1,
        "proj_b": jnp.zeros((1,), jnp.float32),
    }

    ent_idx = jax.random.randint(keys[3], (bs, top_k), 0, num_ents)
    stelp_scores = jax.random.uniform(keys[4], (bs, top_k), jnp.float32)
    rotate_scores = jax.random.uniform(keys[5], (bs, top_k), jnp.float32)
    pos_stelp = jax.random.uniform(keys[6], (bs,), jnp.float32)
    pos_rotate = jax.random.uniform(keys[7], (bs,), jnp.float32)
    neg_stelp = jax.random.uniform(keys[8], (bs, neg_times), jnp.float32)
    neg_rotate = jax.random.uniform(keys[9], (bs, neg_times), jnp.float32)

    # f32 path (strict check): block_bs=8 -> 3 batch tiles, last tile padded.
    loss = ensemble_forward(pos_stelp, pos_rotate, ent_idx, neg_stelp, neg_rotate,
                            stelp_scores, rotate_scores, params, margin=margin,
                            block_bs=8)
    loss = jax.block_until_ready(loss)
    loss_ref = ensemble_forward_ref(pos_stelp, pos_rotate, ent_idx, neg_stelp, neg_rotate,
                                    stelp_scores, rotate_scores, params, margin=margin)
    assert jnp.allclose(loss, loss_ref, rtol=1e-4, atol=1e-5), (loss, loss_ref)

    # bf16-transfer / f32-accumulate path (checked against a bf16-consistent reference).
    loss_bf = ensemble_forward(pos_stelp, pos_rotate, ent_idx, neg_stelp, neg_rotate,
                               stelp_scores, rotate_scores, params, margin=margin,
                               block_bs=8, emb_dtype=jnp.bfloat16)
    loss_bf = jax.block_until_ready(loss_bf)
    loss_ref_bf = ensemble_forward_ref(pos_stelp, pos_rotate, ent_idx, neg_stelp, neg_rotate,
                                       stelp_scores, rotate_scores, params, margin=margin,
                                       emb_dtype=jnp.bfloat16)
    assert jnp.allclose(loss_bf, loss_ref_bf, rtol=1e-3, atol=1e-3), (loss_bf, loss_ref_bf)

    print("KERNEL_OK")
</pallas_src>

<mosaic_0001>
module attributes {stable_mosaic.version = 11 : i64} {
  func.func @ensemble_kernel(%arg0: i32, %arg1: memref<8x8x32xf32, #tpu.memory_space<vmem>>, %arg2: memref<8x128xf32, #tpu.memory_space<vmem>>, %arg3: memref<8x256xf32, #tpu.memory_space<vmem>>, %arg4: memref<1x32xf32, #tpu.memory_space<vmem>>, %arg5: memref<1x128xf32, #tpu.memory_space<vmem>>, %arg6: memref<8x128xf32, #tpu.memory_space<vmem>>) attributes {dimension_semantics = [#tpu.dimension_semantics<parallel>], iteration_bounds = array<i64: 3>, scalar_prefetch = 0 : i64, scratch_operands = 0 : i64, tpu.core_type = #tpu.core_type<tc>, window_params = [{transform_indices = @transform_0, window_bounds = array<i64: 8, 8, 32>}, {transform_indices = @transform_1, window_bounds = array<i64: 8, 128>}, {transform_indices = @transform_2, window_bounds = array<i64: 8, 256>}, {pipeline_mode = #tpu.pipeline_mode<synchronous>, transform_indices = @transform_3, window_bounds = array<i64: 1, 32>}, {pipeline_mode = #tpu.pipeline_mode<synchronous>, transform_indices = @transform_4, window_bounds = array<i64: 1, 128>}, {transform_indices = @transform_5, window_bounds = array<i64: 8, 128>}]} {
    %c0 = arith.constant 0 : index
    %c0_0 = arith.constant 0 : index
    %c0_1 = arith.constant 0 : index
    %0 = vector.load %arg1[%c0, %c0_0, %c0_1] : memref<8x8x32xf32, #tpu.memory_space<vmem>>, vector<8x8x32xf32>
    %cst = arith.constant dense<0.000000e+00> : vector<8x32xf32>
    %1 = vector.multi_reduction <add>, %0, %cst [1] : vector<8x8x32xf32> to vector<8x32xf32>
    %2 = arith.mulf %0, %0 : vector<8x8x32xf32>
    %cst_2 = arith.constant dense<0.000000e+00> : vector<8x32xf32>
    %3 = vector.multi_reduction <add>, %2, %cst_2 [1] : vector<8x8x32xf32> to vector<8x32xf32>
    %4 = arith.mulf %1, %1 : vector<8x32xf32>
    %cst_3 = arith.constant 1.250000e-01 : f32
    %5 = vector.broadcast %cst_3 : f32 to vector<8x32xf32>
    %6 = arith.mulf %4, %5 : vector<8x32xf32>
    %7 = arith.subf %3, %6 : vector<8x32xf32>
    %cst_4 = arith.constant 0.000000e+00 : f32
    %8 = vector.broadcast %cst_4 : f32 to vector<8x32xf32>
    %9 = arith.maximumf %7, %8 : vector<8x32xf32>
    %cst_5 = arith.constant 0.142857149 : f32
    %10 = vector.broadcast %cst_5 : f32 to vector<8x32xf32>
    %11 = arith.mulf %9, %10 : vector<8x32xf32>
    %12 = math.sqrt %11 : vector<8x32xf32>
    %c0_6 = arith.constant 0 : index
    %c0_7 = arith.constant 0 : index
    %13 = vector.load %arg4[%c0_6, %c0_7] : memref<1x32xf32, #tpu.memory_space<vmem>>, vector<1x32xf32>
    %14 = vector.broadcast %13 : vector<1x32xf32> to vector<8x32xf32>
    %15 = arith.mulf %12, %14 : vector<8x32xf32>
    %cst_8 = arith.constant dense<0.000000e+00> : vector<8xf32>
    %16 = vector.multi_reduction <add>, %15, %cst_8 [1] : vector<8x32xf32> to vector<8xf32>
    %17 = vector.shape_cast %16 : vector<8xf32> to vector<8x1xf32>
    %c0_9 = arith.constant 0 : index
    %c0_10 = arith.constant 0 : index
    %18 = vector.load %arg2[%c0_9, %c0_10] : memref<8x128xf32, #tpu.memory_space<vmem>>, vector<8x128xf32>
    %c0_11 = arith.constant 0 : index
    %c0_12 = arith.constant 0 : index
    %19 = vector.load %arg5[%c0_11, %c0_12] : memref<1x128xf32, #tpu.memory_space<vmem>>, vector<1x128xf32>
    %20 = vector.broadcast %19 : vector<1x128xf32> to vector<8x128xf32>
    %21 = arith.mulf %18, %20 : vector<8x128xf32>
    %cst_13 = arith.constant dense<0.000000e+00> : vector<8xf32>
    %22 = vector.multi_reduction <add>, %21, %cst_13 [1] : vector<8x128xf32> to vector<8xf32>
    %23 = vector.shape_cast %22 : vector<8xf32> to vector<8x1xf32>
    %24 = arith.addf %17, %23 : vector<8x1xf32>
    %25 = arith.negf %24 : vector<8x1xf32>
    %26 = math.exp %25 : vector<8x1xf32>
    %cst_14 = arith.constant 1.000000e+00 : f32
    %27 = vector.broadcast %cst_14 : f32 to vector<8x1xf32>
    %28 = arith.addf %27, %26 : vector<8x1xf32>
    %29 = arith.divf %27, %28 : vector<8x1xf32>
    %c0_15 = arith.constant 0 : index
    %c0_16 = arith.constant 0 : index
    %30 = vector.load %arg3[%c0_15, %c0_16] : memref<8x256xf32, #tpu.memory_space<vmem>>, vector<8x128xf32>
    %c0_17 = arith.constant 0 : index
    %c128 = arith.constant 128 : index
    %31 = vector.load %arg3[%c0_17, %c128] : memref<8x256xf32, #tpu.memory_space<vmem>>, vector<8x128xf32>
    %32 = vector.broadcast %29 : vector<8x1xf32> to vector<8x128xf32>
    %33 = arith.mulf %32, %30 : vector<8x128xf32>
    %cst_18 = arith.constant 5.000000e-01 : f32
    %34 = vector.broadcast %cst_18 : f32 to vector<8x128xf32>
    %35 = arith.addf %34, %33 : vector<8x128xf32>
    %cst_19 = arith.constant 1.000000e+00 : f32
    %36 = vector.broadcast %cst_19 : f32 to vector<8x1xf32>
    %37 = arith.subf %36, %29 : vector<8x1xf32>
    %38 = vector.broadcast %37 : vector<8x1xf32> to vector<8x128xf32>
    %39 = arith.mulf %38, %31 : vector<8x128xf32>
    %40 = arith.addf %35, %39 : vector<8x128xf32>
    %cst_20 = arith.constant 0.000000e+00 : f32
    %41 = vector.broadcast %cst_20 : f32 to vector<8x128xf32>
    %42 = arith.maximumf %40, %41 : vector<8x128xf32>
    %43 = vector.shape_cast %42 : vector<8x128xf32> to vector<1x8x128xf32>
    %cst_21 = arith.constant dense<0.000000e+00> : vector<1xf32>
    %44 = vector.multi_reduction <add>, %43, %cst_21 [1, 2] : vector<1x8x128xf32> to vector<1xf32>
    %45 = vector.shape_cast %44 : vector<1xf32> to vector<1x1x1xf32>
    %46 = vector.extract %45[0, 0, 0] : f32 from vector<1x1x1xf32>
    %cst_22 = arith.constant 0.000000e+00 : f32
    %47 = vector.broadcast %cst_22 : f32 to vector<8x128xf32>
    %48 = vector.broadcast %46 : f32 to vector<8x128xf32>
    %49 = arith.addf %47, %48 : vector<8x128xf32>
    %c0_23 = arith.constant 0 : index
    %c0_24 = arith.constant 0 : index
    %50 = vector.load %arg6[%c0_23, %c0_24] : memref<8x128xf32, #tpu.memory_space<vmem>>, vector<8x128xf32>
    tpu.vector_store %arg6[%c0_23, %c0_24], %49 {strides = array<i32>} : memref<8x128xf32, #tpu.memory_space<vmem>>, vector<8x128xf32>,
    return
  }
  func.func @transform_0(%arg0: i32) -> (i32, i32, i32) {
    %c0_i32 = arith.constant 0 : i32
    %c0_i32_0 = arith.constant 0 : i32
    %c0_i32_1 = arith.constant 0 : i32
    return %arg0, %c0_i32, %c0_i32_0 : i32, i32, i32
  }
  func.func @transform_1(%arg0: i32) -> (i32, i32) {
    %c0_i32 = arith.constant 0 : i32
    %c0_i32_0 = arith.constant 0 : i32
    return %arg0, %c0_i32 : i32, i32
  }
  func.func @transform_2(%arg0: i32) -> (i32, i32) {
    %c0_i32 = arith.constant 0 : i32
    %c0_i32_0 = arith.constant 0 : i32
    return %arg0, %c0_i32 : i32, i32
  }
  func.func @transform_3(%arg0: i32) -> (i32, i32) {
    %c0_i32 = arith.constant 0 : i32
    %c0_i32_0 = arith.constant 0 : i32
    %c0_i32_1 = arith.constant 0 : i32
    return %c0_i32, %c0_i32_0 : i32, i32
  }
  func.func @transform_4(%arg0: i32) -> (i32, i32) {
    %c0_i32 = arith.constant 0 : i32
    %c0_i32_0 = arith.constant 0 : i32
    %c0_i32_1 = arith.constant 0 : i32
    return %c0_i32, %c0_i32_0 : i32, i32
  }
  func.func @transform_5(%arg0: i32) -> (i32, i32) {
    %c0_i32 = arith.constant 0 : i32
    %c0_i32_0 = arith.constant 0 : i32
    return %arg0, %c0_i32 : i32, i32
  }
}

</mosaic_0001>

<bundles_post_ra>
// kernel: tpu_custom_call.1
= control target key start
LH: loop header
LB: loop body
LE: loop exit
PB: predicated region body
PF: predicated region fallthrough
CT: control target
= control target key end

     0   :  { %s1399_s0 = inlined_call_operand.hbm [shape: f32[24,8,32], index: 0, kind: input, shape index: {}]   ;;  %s1400_s1 = inlined_call_operand.hbm [shape: f32[24,128], index: 1, kind: input, shape index: {}]   ;;  %s1401_s2 = inlined_call_operand.hbm [shape: f32[24,256], index: 2, kind: input, shape index: {}]   ;;  %s1402_s3 = inlined_call_operand.vmem [shape: f32[1,32], index: 3, kind: input, shape index: {}]   ;;  %s1403_s4 = inlined_call_operand.vmem [shape: f32[1,128], index: 4, kind: input, shape index: {}]   ;;  %s1404_s5 = inlined_call_operand.hbm [shape: f32[24,128], index: 5, kind: output, shape index: {}]  }
   0x1   :  { %1413 = sst [smem:[#allocation17_spill]] %s1399_s0 }
   0x2   :  { %1414 = sst [smem:[#allocation18_spill]] %s1400_s1 }
   0x3   :  { %10 = vsyncpa [#allocation3], 0 }
   0x4   :  { %12 = vsyncpa [#allocation3 + $0x1], 0 }
   0x5   :  { %13 = vsyncpa [#allocation6], 0 }
   0x6   :  { %15 = vsyncpa [#allocation6 + $0x1], 0 }
   0x7   :  { %16 = vsyncpa [#allocation4], 0 }
   0x8   :  { %18 = vsyncpa [#allocation4 + $0x1], 0  ;;  %s1049_s18 = smov 0   ;;  %s1051_s19 = smov 0  }
   0x9   :  { %s1053_s20 = smov 0   ;;  %s1055_s21 = smov 0  }
   0xa LB: > { %1415 = sst [smem:[#allocation12_spill]] %s999_s18  ;;  %s1070_s22 = sadd.s32 4294967295, %s1011_s21   ;;  %s1011_s21 = sphi %s1055_s21, %s1440_s21   ;;  %s1007_s20 = sphi %s1053_s20, %s1442_s20   ;;  %s1003_s19 = sphi %s1051_s19, %s1444_s19   ;;  %s999_s18 = sphi %s1049_s18, %s1443_s18  }
   0xb   : > { %1416 = sst [smem:[#allocation13_spill]] %s1007_s20  ;;  %s754_s23 = sadd.s32 4294967294, %s1011_s21  }
   0xc   : > { %s1074_s24 = sadd.s32 1, %s1011_s21   ;;  %s31_s25 = sadd.s32 1, %s1007_s20 }
   0xd   : > { %1417 = sst [smem:[#allocation14_spill]] %s1074_s24  ;;  %s28_s26 = ssub.s32 %s1011_s21, %s1074_s24 }
   0xe   : > { %p38_p0 = scmp.ne.s32.totalorder %s1007_s20, %s1003_s19  ;;  %p29_p1 = scmp.eq.s32.totalorder %s28_s26, 0 }
   0xf   : > { %p39_p2 = scmp.eq.s32.totalorder %s1011_s21, 0  ;;  %p44_p3 = scmp.ne.s32.totalorder %s1003_s19, %s999_s18 }
  0x10   : > { %p45_p4 = scmp.eq.s32.totalorder %s1070_s22, 0  ;;  %p162_p7 = scmp.eq.s32.totalorder %s1070_s22, 2 }
  0x11   : > { %s1086_s27 = scalar_select %p29_p1, %s1007_s20, %s31_s25  }
  0x12   : > { %p40_p5 = por %p39_p2, %p38_p0  ;;  %p1088_p6 = por %p45_p4, %p44_p3 }
  0x13   : > { %1418 = sst [smem:[#allocation15_spill]] %s1086_s27  ;;  %p168_p8 = scmp.eq.s32.totalorder %s754_s23, 2 }
  0x14   : > { %s1419_s28 = scalar_select %p1088_p6, 1, 0 }
  0x15   : > { %p803_p9 = scmp.lt.s32.totalorder %s1011_s21, 3  ;;  %p1094_p10 = por %p162_p7, %p38_p0 }
  0x16   : > { %p1098_p11 = por %p168_p8, %p44_p3  ;;  %s1103_s6 = sand.u32 1, %s1007_s20  }
  0x17   : > { %s1420_s29 = scalar_select %p1094_p10, 1, 0 }
  0x18   : > { %s1421_s30 = scalar_select %p1098_p11, 1, 0 }
  0x19   : > { %p1105_p12 = pnand %p803_p9, %p40_p5  ;;  %s215_s8 = sand.u32 1, %s1011_s21  }
  0x1a   : > { %1422 = sst [smem:[#allocation16_spill]] %s1421_s30  ;;  %s760_s9 = sshll.u32 %s1103_s6, 3 }
  0x1b   : > { %s761_s10 = sshll.u32 %s1011_s21, 7  ;;  %s1424_s1 = sld [smem:[#allocation18_spill]] }
  0x1c   : > { %s219_s14 = scalar_lea.vmem [#allocation5], %s760_s9  ;;  %s1118_s16 = scalar_lea.sflag [#allocation6], %s215_s8 }
  0x1d   : > { %s226_s15 = sshll.u32 %s219_s14, 4  ;;  %p1124_p1 = pneg %p1105_p12  ;;  %s227_s15 = int_to_ptr.vmem [resolvable:$true] %s226_s15 }
  0x21   : > { %s1115_s13 = scalar_lea.hbm %s1424_s1, %s761_s10  ;;  %s864_s9 = scalar_lea.hbm %s1424_s1, 384 }
  0x22   : > { %s859_s17 = scalar_lea.hbm %s1115_s13, 128  ;;  %p865_p4 = scmp.lt.s32.totalorder %s1115_s13, %s1424_s1 }
  0x23   : > { %p860_p0 = scmp.ne.s32.totalorder %s1115_s13, %s859_s17  ;;  %p866_p5 = scmp.lt.s32.totalorder %s864_s9, %s859_s17 }
  0x25   : > { %p862_p2 = pnand %p1124_p1, %p860_p0  ;;  %p867_p7 = por %p866_p5, %p865_p4 }
  0x27   : > { %p863_p3 = pneg %p862_p2 }
  0x29   : > { %p868_p8 = pnand %p867_p7, %p863_p3 }
  0x2b   : > { %871 = shalt.err (!%p868_p8)
}
  0x2c   : > { %s872_s8 = scalar_lea.vmem %s227_s15, 128  ;;  %s1013_s12 = smov [#allocation5]  }
  0x2d   : > { %p873_p9 = scmp.ne.s32.totalorder %s227_s15, %s872_s8  ;;  %s877_s14 = sshll.u32 %s1013_s12, 4  ;;  %s878_s14 = int_to_ptr.vmem [resolvable:$false] %s877_s14 }
  0x2e   : > { %s879_s27 = scalar_lea.vmem %s878_s14, 256  ;;  %p880_p0 = scmp.lt.s32.totalorder %s227_s15, %s878_s14 }
  0x2f   : > { %p875_p13 = pnand %p873_p9, %p1124_p1  ;;  %p881_p2 = scmp.lt.s32.totalorder %s879_s27, %s872_s8 }
  0x31   : > { %p876_p11 = pneg %p875_p13  ;;  %p882_p10 = por %p881_p2, %p880_p0 }
  0x33   : > { %p883_p6 = pnand %p882_p10, %p876_p11 }
  0x35   : > { %886 = shalt.err (!%p883_p6)
}
  0x36   : > { %795 = dma.hbm_to_vmem [thread:$0]  (!%p1105_p12), %s1115_s13, 128, %s227_s15, %s1118_s16  }
  0x37   : > { %p250_p13 = scmp.lt.s32.totalorder %s1011_s21, 4  ;;  %s757_s17 = sshll.u32 %s1103_s6, 6 }
  0x38   : > { %s777_s25 = sshll.u32 %s1011_s21, 10  ;;  %p1426_p3 = scmp.ge.s32.totalorder %s1011_s21, 1 }
  0x39   : > { %s1428_s0 = sld [smem:[#allocation17_spill]]  ;;  %s198_s11 = scalar_lea.vmem [#allocation2], %s757_s17 }
  0x3a   : > { %p1148_p4 = pnand %p1426_p3, %p250_p13  ;;  %s205_s8 = sshll.u32 %s198_s11, 4  ;;  %s1157_s8 = int_to_ptr.vmem [resolvable:$true] %s205_s8 }
  0x3b   : > { %s762_s13 = sshll.u32 %s1103_s6, 4  ;;  %s195_s15 = scalar_lea.sflag [#allocation3], %s1103_s6 }
  0x3c   : > { %s1427_s27 = scalar_select %p1148_p4, 1, 0 }
  0x3f   : > { %s1155_s10 = scalar_lea.hbm %s1428_s0, %s777_s25  ;;  %s892_s26 = scalar_lea.hbm %s1428_s0, 3072 }
  0x40   : > { %s887_s12 = scalar_lea.hbm %s1155_s10, 1024  ;;  %p893_p5 = scmp.lt.s32.totalorder %s1155_s10, %s1428_s0 }
  0x41   : > { %p888_p6 = scmp.ne.s32.totalorder %s1155_s10, %s887_s12  ;;  %p894_p7 = scmp.lt.s32.totalorder %s892_s26, %s887_s12 }
  0x43   : > { %p890_p10 = pnand %p888_p6, %p1124_p1  ;;  %p895_p8 = por %p894_p7, %p893_p5 }
  0x45   : > { %p891_p11 = pneg %p890_p10 }
  0x47   : > { %p896_p9 = pnand %p895_p8, %p891_p11 }
  0x49   : > { %899 = shalt.err (!%p896_p9)
}
  0x4a   : > { %s900_s17 = scalar_lea.vmem %s1157_s8, 1024  ;;  %s1014_s11 = smov [#allocation2]  }
  0x4b   : > { %p901_p0 = scmp.ne.s32.totalorder %s1157_s8, %s900_s17  ;;  %s905_s1 = sshll.u32 %s1014_s11, 4  ;;  %s906_s1 = int_to_ptr.vmem [resolvable:$false] %s905_s1 }
  0x4c   : > { %s907_s14 = scalar_lea.vmem %s906_s1, 2048  ;;  %p908_p3 = scmp.lt.s32.totalorder %s1157_s8, %s906_s1 }
  0x4d   : > { %p903_p2 = pnand %p901_p0, %p1124_p1  ;;  %p909_p6 = scmp.lt.s32.totalorder %s907_s14, %s900_s17 }
  0x4f   : > { %p904_p13 = pneg %p903_p2  ;;  %p910_p10 = por %p909_p6, %p908_p3 }
  0x51   : > { %p911_p4 = pnand %p910_p10, %p904_p13 }
  0x53   : > { %914 = shalt.err (!%p911_p4)
}
  0x54   : > { %s1015_s12 = smov 128   ;;  %s1016_s26 = smov 8  }
  0x55   : > { %792 = dma.hbm_to_vmem [thread:$0]  (!%p1105_p12), %s1155_s10, 1024, %s1157_s8, %s195_s15, %s1015_s12, %s1015_s12, %s1016_s26  }
  0x56   : > { %s778_s25 = sshll.u32 %s1011_s21, 8  ;;  %s237_s1 = scalar_lea.vmem [#allocation7], %s762_s13 }
  0x57   : > { %s243_s17 = scalar_lea.hbm %s1401_s2, %s778_s25  ;;  %s245_s14 = sshll.u32 %s237_s1, 4  ;;  %s246_s14 = int_to_ptr.vmem [resolvable:$true] %s245_s14 }
  0x58   : > { %s915_s0 = scalar_lea.hbm %s243_s17, 256  ;;  %s920_s30 = scalar_lea.hbm %s1401_s2, 768 }
  0x59   : > { %p916_p4 = scmp.ne.s32.totalorder %s243_s17, %s915_s0  ;;  %p921_p7 = scmp.lt.s32.totalorder %s243_s17, %s1401_s2 }
  0x5a   : > { %p922_p8 = scmp.lt.s32.totalorder %s920_s30, %s915_s0 }
  0x5b   : > { %p918_p11 = pnand %p916_p4, %p1124_p1 }
  0x5c   : > { %p923_p9 = por %p922_p8, %p921_p7 }
  0x5d   : > { %p919_p5 = pneg %p918_p11 }
  0x5f   : > { %p924_p0 = pnand %p923_p9, %p919_p5 }
  0x61   : > { %927 = shalt.err (!%p924_p0)
}
  0x62   : > { %s928_s6 = scalar_lea.vmem %s246_s14, 256  ;;  %s1017_s8 = smov [#allocation7]  }
  0x63   : > { %p929_p2 = scmp.ne.s32.totalorder %s246_s14, %s928_s6  ;;  %s933_s13 = sshll.u32 %s1017_s8, 4  ;;  %s934_s13 = int_to_ptr.vmem [resolvable:$false] %s933_s13 }
  0x64   : > { %s935_s15 = scalar_lea.vmem %s934_s13, 512  ;;  %p936_p6 = scmp.lt.s32.totalorder %s246_s14, %s934_s13 }
  0x65   : > { %p931_p13 = pnand %p929_p2, %p1124_p1  ;;  %p937_p10 = scmp.lt.s32.totalorder %s935_s15, %s928_s6 }
  0x67   : > { %p932_p3 = pneg %p931_p13  ;;  %p938_p4 = por %p937_p10, %p936_p6 }
  0x69   : > { %p939_p11 = pnand %p938_p4, %p932_p3 }
  0x6b   : > { %942 = shalt.err (!%p939_p11)
}
  0x6c   : > { %798 = dma.hbm_to_vmem [thread:$0]  (!%p1105_p12), %s243_s17, 256, %s246_s14, %s1118_s16  }
  0x6d   : > { %p1429_p5 = scmp.ne.s32.totalorder %s1427_s27, 0 }
  0x6e   : > { %s1205_s0 = sand.u32 (!%p1429_p5), 1, %s1003_s19   ;;  %p1430_p1 = scmp.ne.s32.totalorder (!%p1429_p5), %s1419_s28, 0 }
  0x6f   : > { %254 = sbr.rel (%p1429_p5) target bundleno = 592 (0x250), region = 40  ;;  %s766_s18 = sshll.u32 (!%p1429_p5), %s1205_s0, 6 }
  0x70   : > { %s257_s20 = scalar_lea.sflag (!%p1429_p5), [#allocation3], %s1205_s0  ;;  %s260_s24 = scalar_lea.vmem (!%p1429_p5), [#allocation2], %s766_s18 }
  0x74   : > { %986 = dma.done.wait (%p1430_p1), %s257_s20, 1024  }
  0x75   : > { %988 = vsyncadd (%p1430_p1), %s257_s20, 4294966272  ;;  %s265_s30 = sand.u32 1, %s1070_s22   ;;  %s767_s7 = sshll.u32 %s1205_s0, 3 }
  0x76   : > { %s266_s16 = scalar_lea.sflag [#allocation6], %s265_s30  ;;  %s1217_s23 = scalar_lea.vmem [#allocation5], %s767_s7 }
  0x77   : > { %990 = dma.done.wait (%p1430_p1), %s266_s16, 384  }
  0x78   : > { %992 = vsyncadd (%p1430_p1), %s266_s16, 4294966912  ;;  %vm1412_vm0 = vcmask 261120   ;;  %v316_v0 = vld [vmem:[%s260_s24] sm:$0xff]  ;;  %v317_v1 = vld [vmem:[%s260_s24 + $0x8] sm:$0xff]  ;;  %vm571_vm10 = vcmask 1043459   ;;  %vm574_vm14 = vcmask 1044484  }
  0x79   : > { %v318_v2 = vld [vmem:[%s260_s24 + $0x10] sm:$0xff]  ;;  %v319_v3 = vld [vmem:[%s260_s24 + $0x18] sm:$0xff]  ;;  %v320_v4 = vld [vmem:[%s260_s24 + $0x20] sm:$0xff]  ;;  %v325_v6 = vsel %vm1412_vm0, %v316_v0, 0.0  ;;  %v332_v7 = vsel %vm1412_vm0, %v317_v1, 0.0  ;;  %v381_v9 = vmul.f32 %v316_v0, %v316_v0  ;;  %v382_v61 = vmul.f32 %v317_v1, %v317_v1  ;;  %s768_s25 = sshll.u32 %s1205_s0, 4 }
  0x7a   : > { %v321_v5 = vld [vmem:[%s260_s24 + $0x28] sm:$0xff]  ;;  %v339_v8 = vsel %vm1412_vm0, %v318_v2, 0.0  ;;  %v322_v10 = vld [vmem:[%s260_s24 + $0x30] sm:$0xff]  ;;  %v323_v11 = vld [vmem:[%s260_s24 + $0x38] sm:$0xff]  ;;  %v326_v12 = vrot.slane %v325_v6, 4  ;;  %v333_v13 = vrot.slane %v332_v7, 4  ;;  %v383_v62 = vmul.f32 %v318_v2, %v318_v2 }
  0x7b   : > { %v340_v14 = vrot.slane %v339_v8, 4  ;;  %v346_v15 = vsel %vm1412_vm0, %v319_v3, 0.0  ;;  %v353_v17 = vsel %vm1412_vm0, %v320_v4, 0.0  ;;  %v360_v18 = vsel %vm1412_vm0, %v321_v5, 0.0  ;;  %s278_s9 = scalar_lea.vmem [#allocation7], %s768_s25  ;;  %s314_s11 = scalar_lea.vmem [#allocation8], %s767_s7 }
  0x7c   : > { %v347_v16 = vrot.slane %v346_v15, 4  ;;  %v367_v19 = vsel %vm1412_vm0, %v322_v10, 0.0  ;;  %v327_v20 = vadd.f32 %v326_v12, %v325_v6  ;;  %v334_v21 = vadd.f32 %v333_v13, %v332_v7  ;;  %s641_s17 = sshll.u32 %s314_s11, 4  ;;  %s774_s1 = sshll.u32 %s1070_s22, 7  ;;  %s1360_s17 = int_to_ptr.vmem [resolvable:$true] %s641_s17 }
  0x7d   : > { %v341_v22 = vadd.f32 %v340_v14, %v339_v8  ;;  %v354_v23 = vrot.slane %v353_v17, 4  ;;  %v361_v25 = vrot.slane %v360_v18, 4  ;;  %v368_v26 = vrot.slane %v367_v19, 4  ;;  %s639_s8 = scalar_lea.hbm %s1404_s5, %s774_s1  ;;  %s628_s13 = scalar_lea.sflag [#allocation4], %s1205_s0 }
  0x7e   : > { %v348_v24 = vadd.f32 %v347_v16, %v346_v15  ;;  %v374_v27 = vsel %vm1412_vm0, %v323_v11, 0.0  ;;  %v328_v28 = vrot.slane %v327_v20, 2  ;;  %v335_v29 = vrot.slane %v334_v21, 2  ;;  %s943_s15 = scalar_lea.vmem %s1360_s17, 128  ;;  %p1436_p7 = scmp.ne.s32.totalorder %s1420_s29, 0 }
  0x7f   : > { %v342_v30 = vrot.slane %v341_v22, 2  ;;  %v355_v31 = vadd.f32 %v354_v23, %v353_v17  ;;  %v362_v33 = vadd.f32 %v361_v25, %v360_v18  ;;  %v369_v34 = vadd.f32 %v368_v26, %v367_v19  ;;  %p944_p12 = scmp.ne.s32.totalorder %s1360_s17, %s943_s15  ;;  %s1018_s18 = smov [#allocation8]  }
  0x80   : > { %v349_v32 = vrot.slane %v348_v24, 2  ;;  %v375_v35 = vrot.slane %v374_v27, 4  ;;  %v329_v36 = vadd.f32 %v328_v28, %v327_v20  ;;  %v336_v37 = vadd.f32 %v335_v29, %v334_v21  ;;  %s947_s22 = sshll.u32 %s1018_s18, 4  ;;  %s948_s22 = int_to_ptr.vmem [resolvable:$false] %s947_s22 }
  0x81   : > { %v343_v38 = vadd.f32 %v342_v30, %v341_v22  ;;  %v356_v39 = vrot.slane %v355_v31, 2  ;;  %v363_v41 = vrot.slane %v362_v33, 2  ;;  %v370_v42 = vrot.slane %v369_v34, 2  ;;  %p945_p8 = pnand %p944_p12, %p1436_p7  ;;  %s949_s20 = scalar_lea.vmem %s948_s22, 256 }
  0x82   : > { %v350_v40 = vadd.f32 %v349_v32, %v348_v24  ;;  %v376_v43 = vadd.f32 %v375_v35, %v374_v27  ;;  %v330_v44 = vrot.slane %v329_v36, 1  ;;  %v337_v45 = vrot.slane %v336_v37, 1  ;;  %p950_p0 = scmp.lt.s32.totalorder %s1360_s17, %s948_s22  ;;  %p951_p2 = scmp.lt.s32.totalorder %s949_s20, %s943_s15 }
  0x83   : > { %v344_v46 = vrot.slane %v343_v38, 1  ;;  %v357_v47 = vadd.f32 %v356_v39, %v355_v31  ;;  %v364_v49 = vadd.f32 %v363_v41, %v362_v33  ;;  %v371_v50 = vadd.f32 %v370_v42, %v369_v34  ;;  %p946_p9 = pneg %p945_p8 }
  0x84   : > { %v351_v48 = vrot.slane %v350_v40, 1  ;;  %v377_v51 = vrot.slane %v376_v43, 2  ;;  %v1231_v52 = vadd.f32 %v330_v44, %v329_v36  ;;  %v1233_v53 = vadd.f32 %v337_v45, %v336_v37  ;;  %p952_p13 = por %p951_p2, %p950_p0 }
  0x85   : > { %v1235_v54 = vadd.f32 %v344_v46, %v343_v38  ;;  %v358_v55 = vrot.slane %v357_v47, 1  ;;  %v365_v57 = vrot.slane %v364_v49, 1  ;;  %v372_v58 = vrot.slane %v371_v50, 1 }
  0x86   : > { %v1237_v56 = vadd.f32 %v351_v48, %v350_v40  ;;  %v378_v59 = vadd.f32 %v377_v51, %v376_v43  ;;  %v384_v63 = vmul.f32 %v319_v3, %v319_v3  ;;  %v385_v8 = vmul.f32 %v320_v4, %v320_v4  ;;  %p953_p3 = pnand %p952_p13, %p946_p9 }
  0x87   : > { %v1239_v60 = vadd.f32 %v358_v55, %v357_v47  ;;  %v1241_v0 = vadd.f32 %v365_v57, %v364_v49  ;;  %v1243_v6 = vadd.f32 %v372_v58, %v371_v50  ;;  %v386_v12 = vmul.f32 %v321_v5, %v321_v5 }
  0x88   : > { %v379_v7 = vrot.slane %v378_v59, 1  ;;  %v387_v13 = vmul.f32 %v322_v10, %v322_v10  ;;  %v388_v14 = vmul.f32 %v323_v11, %v323_v11  ;;  %v389_v15 = vsel %vm1412_vm0, %v381_v9, 0.0 }
  0x89   : > { %v390_v17 = vrot.slane %v389_v15, 4  ;;  %v396_v18 = vsel %vm1412_vm0, %v382_v61, 0.0  ;;  %v403_v19 = vsel %vm1412_vm0, %v383_v62, 0.0  ;;  %v410_v3 = vsel %vm1412_vm0, %v384_v63, 0.0 }
  0x8a   : > { %v380_v16 = vadd.f32 %v379_v7, %v378_v59  ;;  %v397_v1 = vrot.slane %v396_v18, 4  ;;  %v404_v2 = vrot.slane %v403_v19, 4  ;;  %v417_v20 = vsel %vm1412_vm0, %v385_v8, 0.0 }
  0x8b   : > { %v391_v21 = vadd.f32 %v390_v17, %v389_v15  ;;  %v411_v22 = vrot.slane %v410_v3, 4  ;;  %v418_v4 = vrot.slane %v417_v20, 4  ;;  %v424_v5 = vsel %vm1412_vm0, %v386_v12, 0.0 }
  0x8c   : > { %v398_v10 = vadd.f32 %v397_v1, %v396_v18  ;;  %v405_v11 = vadd.f32 %v404_v2, %v403_v19  ;;  %v425_v9 = vrot.slane %v424_v5, 4  ;;  %v431_v23 = vsel %vm1412_vm0, %v387_v13, 0.0 }
  0x8d   : > { %v392_v24 = vrot.slane %v391_v21, 2  ;;  %v412_v25 = vadd.f32 %v411_v22, %v410_v3  ;;  %v419_v26 = vadd.f32 %v418_v4, %v417_v20  ;;  %v432_v27 = vrot.slane %v431_v23, 4 }
  0x8e   : > { %v399_v28 = vrot.slane %v398_v10, 2  ;;  %v406_v29 = vrot.slane %v405_v11, 2  ;;  %v426_v30 = vadd.f32 %v425_v9, %v424_v5  ;;  %v438_v31 = vsel %vm1412_vm0, %v388_v14, 0.0 }
  0x8f   : > { %v393_v32 = vadd.f32 %v392_v24, %v391_v21  ;;  %v413_v33 = vrot.slane %v412_v25, 2  ;;  %v420_v34 = vrot.slane %v419_v26, 2  ;;  %v433_v35 = vadd.f32 %v432_v27, %v431_v23 }
  0x90   : > { %v400_v36 = vadd.f32 %v399_v28, %v398_v10  ;;  %v407_v37 = vadd.f32 %v406_v29, %v405_v11  ;;  %v427_v38 = vrot.slane %v426_v30, 2  ;;  %v439_v39 = vrot.slane %v438_v31, 4 }
  0x91   : > { %v394_v40 = vrot.slane %v393_v32, 1  ;;  %v414_v41 = vadd.f32 %v413_v33, %v412_v25  ;;  %v421_v42 = vadd.f32 %v420_v34, %v419_v26  ;;  %v434_v43 = vrot.slane %v433_v35, 2 }
  0x92   : > { %v401_v44 = vrot.slane %v400_v36, 1  ;;  %v408_v45 = vrot.slane %v407_v37, 1  ;;  %v428_v46 = vadd.f32 %v427_v38, %v426_v30  ;;  %v440_v47 = vadd.f32 %v439_v39, %v438_v31 }
  0x93   : > { %v395_v48 = vadd.f32 %v394_v40, %v393_v32  ;;  %v415_v49 = vrot.slane %v414_v41, 1  ;;  %v422_v50 = vrot.slane %v421_v42, 1  ;;  %v435_v51 = vadd.f32 %v434_v43, %v433_v35 }
  0x94   : > { %v402_v55 = vadd.f32 %v401_v44, %v400_v36  ;;  %v409_v57 = vadd.f32 %v408_v45, %v407_v37  ;;  %v429_v58 = vrot.slane %v428_v46, 1  ;;  %v441_v59 = vrot.slane %v440_v47, 2 }
  0x95   : > { %v416_v61 = vadd.f32 %v415_v49, %v414_v41  ;;  %v423_v62 = vadd.f32 %v422_v50, %v421_v42  ;;  %v436_v63 = vrot.slane %v435_v51, 1  ;;  %v445_v7 = vmul.f32 %v1231_v52, %v1231_v52 }
  0x96   : > { %v430_v8 = vadd.f32 %v429_v58, %v428_v46  ;;  %v442_v12 = vadd.f32 %v441_v59, %v440_v47  ;;  %v446_v13 = vmul.f32 %v1233_v53, %v1233_v53  ;;  %v447_v14 = vmul.f32 %v1235_v54, %v1235_v54  ;;  %v770_v59 = vld [vmem:[%s1402_s3] ss:$0 sm:$0xff] }
  0x97   : > { %v437_v15 = vadd.f32 %v436_v63, %v435_v51  ;;  %v448_v17 = vmul.f32 %v1237_v56, %v1237_v56  ;;  %v449_v18 = vmul.f32 %v1239_v60, %v1239_v60  ;;  %v450_v19 = vmul.f32 %v1241_v0, %v1241_v0 }
  0x98   : > { %v443_v1 = vrot.slane %v442_v12, 1  ;;  %v451_v52 = vmul.f32 %v1243_v6, %v1243_v6  ;;  %v452_v2 = vmul.f32 %v380_v16, %v380_v16  ;;  %v453_v3 = vmul.f32 0.125, %v445_v7 }
  0x99   : > { %v454_v53 = vmul.f32 0.125, %v446_v13  ;;  %v455_v20 = vmul.f32 0.125, %v447_v14  ;;  %v456_v21 = vmul.f32 0.125, %v448_v17  ;;  %v457_v54 = vmul.f32 0.125, %v449_v18 }
  0x9a   : > { %v444_v22 = vadd.f32 %v443_v1, %v442_v12  ;;  %v458_v4 = vmul.f32 0.125, %v450_v19  ;;  %v459_v5 = vmul.f32 0.125, %v451_v52  ;;  %v460_v56 = vmul.f32 0.125, %v452_v2 }
  0x9b   : > { %v461_v10 = vsub.f32 %v395_v48, %v453_v3  ;;  %v462_v11 = vsub.f32 %v402_v55, %v454_v53  ;;  %v463_v60 = vsub.f32 %v409_v57, %v455_v20  ;;  %v464_v9 = vsub.f32 %v416_v61, %v456_v21 }
  0x9c   : > { %v465_v23 = vsub.f32 %v423_v62, %v457_v54  ;;  %v466_v0 = vsub.f32 %v430_v8, %v458_v4  ;;  %v467_v24 = vsub.f32 %v437_v15, %v459_v5  ;;  %v468_v25 = vsub.f32 %v444_v22, %v460_v56 }
  0x9d   : > { %v469_v26 = vmax.f32 %v461_v10, 0.0  ;;  %v470_v6 = vmax.f32 %v462_v11, 0.0  ;;  %v471_v16 = vmax.f32 %v463_v60, 0.0  ;;  %v472_v27 = vmax.f32 %v464_v9, 0.0 }
  0x9e   : > { %v473_v28 = vmax.f32 %v465_v23, 0.0  ;;  %v474_v29 = vmax.f32 %v466_v0, 0.0  ;;  %v475_v30 = vmax.f32 %v467_v24, 0.0  ;;  %v476_v34 = vmax.f32 %v468_v25, 0.0 }
  0x9f   : > { %v477_v31 = vmul.f32 0.14285715, %v469_v26  ;;  %v478_v32 = vmul.f32 0.14285715, %v470_v6  ;;  %v1267_v33 = vmul.f32 0.14285715, %v471_v16 }
  0xa0   : > { %v1269_v35 = vmul.f32 0.14285715, %v472_v27  ;;  %v1271_v36 = vmul.f32 0.14285715, %v473_v28  ;;  %v1273_v37 = vmul.f32 0.14285715, %v474_v29 }
  0xa1   : > { %839 = vrsqrt.f32 %v477_v31  ;;  %v1275_v38 = vmul.f32 0.14285715, %v475_v30  ;;  %v1278_v39 = vmul.f32 0.14285715, %v476_v34  ;;  %vm487_vm1 = vcmp.eq.f32.partialorder %v477_v31, inf }
  0xa2   : > { %841 = vrsqrt.f32 %v478_v32  ;;  %vm489_vm2 = vcmp.eq.f32.partialorder %v477_v31, 0.0  ;;  %v490_v40 = vand.u32 2147483648, %v477_v31  ;;  %vm494_vm3 = vcmp.eq.f32.partialorder %v478_v32, inf }
  0xa3   : > { %843 = vrsqrt.f32 %v1267_v33  ;;  %vm496_vm4 = vcmp.eq.f32.partialorder %v478_v32, 0.0  ;;  %v497_v41 = vand.u32 2147483648, %v478_v32  ;;  %vm501_vm5 = vcmp.eq.f32.partialorder %v1267_v33, inf }
  0xa4   : > { %845 = vrsqrt.f32 %v1269_v35  ;;  %vm503_vm6 = vcmp.eq.f32.partialorder %v1267_v33, 0.0  ;;  %v504_v42 = vand.u32 2147483648, %v1267_v33  ;;  %vm508_vm7 = vcmp.eq.f32.partialorder %v1269_v35, inf }
  0xa5   : > { %847 = vrsqrt.f32 %v1271_v36  ;;  %vm510_vm8 = vcmp.eq.f32.partialorder %v1269_v35, 0.0  ;;  %v511_v44 = vand.u32 2147483648, %v1269_v35  ;;  %vm515_vm9 = vcmp.eq.f32.partialorder %v1271_v36, inf }
  0xa6   : > { %849 = vrsqrt.f32 %v1273_v37  ;;  %v518_v45 = vand.u32 2147483648, %v1271_v36  ;;  %vm522_vm12 = vcmp.eq.f32.partialorder %v1273_v37, inf  ;;  %v525_v48 = vand.u32 2147483648, %v1273_v37 }
  0xa7   : > { %851 = vrsqrt.f32 %v1275_v38  ;;  %vm529_vm15 = vcmp.eq.f32.partialorder %v1275_v38, inf  ;;  %vm531_vm0 = vcmp.eq.f32.partialorder %v1275_v38, 0.0  ;;  %v532_v51 = vand.u32 2147483648, %v1275_v38 }
  0xa8   : > { %853 = vrsqrt.f32 %v1278_v39  ;;  %vm536_vm11 = vcmp.eq.f32.partialorder %v1278_v39, inf  ;;  %vm538_vm13 = vcmp.eq.f32.partialorder %v1278_v39, 0.0  ;;  %v539_v8 = vand.u32 2147483648, %v1278_v39 }
  0xae   : > { %v840_v43 = vpop.eup %839 }
  0xaf   : > { %v842_v46 = vpop.eup %841  ;;  %v486_v47 = vmul.f32 %v840_v43, %v477_v31 }
  0xb0   : > { %v844_v49 = vpop.eup %843  ;;  %v493_v50 = vmul.f32 %v842_v46, %v478_v32 }
  0xb1   : > { %v846_v55 = vpop.eup %845  ;;  %v488_v57 = vsel %vm487_vm1, %v477_v31, %v486_v47  ;;  %v500_v58 = vmul.f32 %v844_v49, %v1267_v33  ;;  %vm577_vm1 = vcmask 1045509   ;;  %v607_v49 = vld [vmem:[%s278_s9] sm:$0xff] }
  0xb2   : > { %v848_v61 = vpop.eup %847  ;;  %v491_v62 = vsel %vm489_vm2, %v490_v40, %v488_v57  ;;  %v495_v63 = vsel %vm494_vm3, %v478_v32, %v493_v50  ;;  %v507_v7 = vmul.f32 %v846_v55, %v1269_v35  ;;  %vm1431_vm2 = vcmp.eq.f32.partialorder %v1271_v36, 0.0 }
  0xb3   : > { %v850_v12 = vpop.eup %849  ;;  %v498_v13 = vsel %vm496_vm4, %v497_v41, %v495_v63  ;;  %v502_v14 = vsel %vm501_vm5, %v1267_v33, %v500_v58  ;;  %v514_v15 = vmul.f32 %v848_v61, %v1271_v36  ;;  %v548_v17 = vmul.f32 %v770_v59, %v491_v62 }
  0xb4   : > { %v852_v18 = vpop.eup %851  ;;  %v505_v19 = vsel %vm503_vm6, %v504_v42, %v502_v14  ;;  %v509_v1 = vsel %vm508_vm7, %v1269_v35, %v507_v7  ;;  %v521_v52 = vmul.f32 %v850_v12, %v1273_v37  ;;  %v549_v2 = vmul.f32 %v770_v59, %v498_v13 }
  0xb5   : > { %v854_v3 = vpop.eup %853  ;;  %v512_v53 = vsel %vm510_vm8, %v511_v44, %v509_v1  ;;  %v516_v20 = vsel %vm515_vm9, %v1271_v36, %v514_v15  ;;  %v528_v21 = vmul.f32 %v852_v18, %v1275_v38  ;;  %v550_v54 = vmul.f32 %v770_v59, %v505_v19 }
  0xb6   : > { %v519_v22 = vsel %vm1431_vm2, %v518_v45, %v516_v20  ;;  %v523_v4 = vsel %vm522_vm12, %v1273_v37, %v521_v52  ;;  %v535_v5 = vmul.f32 %v854_v3, %v1278_v39  ;;  %v551_v56 = vmul.f32 %v770_v59, %v512_v53 }
  0xb7   : > { %vm1432_vm3 = vcmp.eq.f32.partialorder %v1273_v37, 0.0  ;;  %v530_v11 = vsel %vm529_vm15, %v1275_v38, %v528_v21  ;;  %v552_v60 = vmul.f32 %v770_v59, %v519_v22  ;;  %v564_v9 = vrot.slane %v549_v2, 7  ;;  %v589_v38 = vld [vmem:[%s1217_s23] sm:$0xff] }
  0xb8   : > { %v526_v10 = vsel %vm1432_vm3, %v525_v48, %v523_v4  ;;  %v533_v23 = vsel %vm531_vm0, %v532_v51, %v530_v11  ;;  %v537_v0 = vsel %vm536_vm11, %v1278_v39, %v535_v5  ;;  %v567_v25 = vrot.slane %v550_v54, 6  ;;  %v771_v39 = vld [vmem:[%s1403_s4] ss:$0 sm:$0xff]  ;;  %v608_v51 = vld [vmem:[%s278_s9 + $0x8] sm:$0xff] }
  0xb9   : > { %v553_v24 = vmul.f32 %v770_v59, %v526_v10  ;;  %v540_v26 = vsel %vm538_vm13, %v539_v8, %v537_v0  ;;  %v554_v6 = vmul.f32 %v770_v59, %v533_v23  ;;  %vm1433_vm4 = vcmask 1041409  }
  0xba   : > { %v566_v16 = vsel %vm1433_vm4, %v564_v9, %v548_v17  ;;  %v570_v27 = vrot.slane %v551_v56, 5  ;;  %v555_v28 = vmul.f32 %v770_v59, %v540_v26  ;;  %vm1434_vm5 = vcmask 1042434  }
  0xbb   : > { %v569_v29 = vsel %vm1434_vm5, %v567_v25, %v566_v16  ;;  %v573_v30 = vrot.slane %v552_v60, 4  ;;  %v576_v31 = vrot.slane %v553_v24, 3  ;;  %v579_v33 = vrot.slane %v554_v6, 2 }
  0xbc   : > { %v572_v32 = vsel %vm571_vm10, %v570_v27, %v569_v29  ;;  %vm580_vm0 = vcmask 1046534   ;;  %v582_v35 = vrot.slane %v555_v28, 1  ;;  %vm583_vm6 = vcmask 1047559  }
  0xbd   : > { %v575_v34 = vsel %vm574_vm14, %v573_v30, %v572_v32  ;;  %vm1435_vm7 = vcmask 261120   ;;  %v597_v42 = vmul.f32 %v771_v39, %v589_v38 }
  0xbe   : > { %v578_v36 = vsel %vm577_vm1, %v576_v31, %v575_v34 }
  0xbf   : > { %v581_v37 = vsel %vm580_vm0, %v579_v33, %v578_v36 }
  0xc0   : > { %v584_v40 = vsel %vm583_vm6, %v582_v35, %v581_v37 }
  0xc1   : > { %v586_v41 = vsel %vm1435_vm7, %v584_v40, 0.0 }
  0xc2   : > { %587 = vadd.xlane.f32.xlu0 %v586_v41 }
  0xc6   : > { %598 = vadd.xlane.f32.xlu0 %v597_v42 }
 0x14b   : > { %v588_v43 = vpop.xlane.xlu0 %587 }
 0x14f   : > { %v599_v44 = vpop.xlane.xlu0 %598 }
 0x150   : > { %v600_v45 = vadd.f32 %v599_v44, %v588_v43 }
 0x152   : > { %v772_v46 = vmul.f32 -1.442695, %v600_v45 }
 0x154   : > { %855 = vpow2.f32 %v772_v46 }
 0x161   : > { %v856_v47 = vpop.eup %855 }
 0x162   : > { %v604_v48 = vadd.f32 1.0, %v856_v47 }
 0x164   : > { %857 = vrcp.f32 %v604_v48 }
 0x171   : > { %v858_v50 = vpop.eup %857 }
 0x172   : > { %v609_v55 = vmul.f32 %v858_v50, %v607_v49  ;;  %v611_v57 = vsub.f32 1.0, %v858_v50 }
 0x174   : > { %v610_v58 = vadd.f32 0.5, %v609_v55  ;;  %v612_v59 = vmul.f32 %v611_v57, %v608_v51 }
 0x176   : > { %v613_v61 = vadd.f32 %v612_v59, %v610_v58 }
 0x178   : > { %v614_v62 = vmax.f32 %v613_v61, 0.0 }
 0x17a   : > { %615 = vadd.xlane.f32.xlu1 %v614_v62 }
 0x203   : > { %v616_v63 = vpop.xlane.xlu1 %615 }
 0x204   : > { %v617_v7 = vrot.slane %v616_v63, 4 }
 0x206   : > { %v618_v8 = vadd.f32 %v617_v7, %v616_v63 }
 0x208   : > { %v619_v12 = vrot.slane %v618_v8, 2 }
 0x20a   : > { %v620_v13 = vadd.f32 %v619_v12, %v618_v8 }
 0x20c   : > { %v621_v14 = vrot.slane %v620_v13, 1 }
 0x20e   : > { %v622_v15 = vadd.f32 %v621_v14, %v620_v13 }
 0x210   : > { %779 = vpush %v622_v15 }
 0x241   : > { %s780_s14 = spop %779 }
 0x242   : > { %v624_v17 = vstv %s780_s14 }
 0x243   : > { %626 = vst [vmem:[%s314_s11] sm:$0xff] %v624_v17 }
 0x244   : > { %956 = shalt.err (!%p953_p3)
}
 0x245   : > { %s957_s24 = scalar_lea.hbm %s639_s8, 128  ;;  %s961_s7 = scalar_lea.hbm %s1404_s5, 384 }
 0x246   : > { %p958_p6 = scmp.ne.s32.totalorder %s639_s8, %s957_s24  ;;  %p962_p11 = scmp.lt.s32.totalorder %s639_s8, %s1404_s5 }
 0x247   : > { %p963_p5 = scmp.lt.s32.totalorder %s961_s7, %s957_s24 }
 0x248   : > { %p959_p10 = pnand %p958_p6, %p1436_p7 }
 0x249   : > { %p964_p1 = por %p963_p5, %p962_p11 }
 0x24a   : > { %p960_p4 = pneg %p959_p10 }
 0x24c   : > { %p965_p12 = pnand %p964_p1, %p960_p4 }
 0x24e   : > { %968 = shalt.err (!%p965_p12)
}
 0x24f   : > { %787 = dma.vmem_to_hbm [thread:$0]  (%p1436_p7), %s1360_s17, 128, %s639_s8, %s628_s13  }
 0x250 PF: > { %s1437_s28 = sld [smem:[#allocation12_spill]]  ;;  %p804_p8 = scmp.ge.s32.totalorder %s1011_s21, 2 }
 0x251   : > { %s1438_s27 = sld [smem:[#allocation16_spill]] }
 0x256   : > { %s653_s12 = sand.u32 1, %s1437_s28  }
 0x257   : > { %p1439_p9 = scmp.ne.s32.totalorder %s1438_s27, 0  ;;  %s654_s26 = scalar_lea.sflag [#allocation4], %s653_s12 }
 0x259   : > { %p800_p0 = pnand %p804_p8, %p1439_p9 }
 0x25b   : > { %p801_p2 = pneg %p800_p0 }
 0x25d   : > { %994 = dma.done.wait (%p801_p2), %s654_s26, 128  }
 0x25e   : > { %996 = vsyncadd (%p801_p2), %s654_s26, 4294967168  ;;  %s1440_s21 = sld [smem:[#allocation14_spill]]  ;;  %s1443_s18 = smov %s1003_s19 }
 0x25f   : > { %s1441_s25 = sld [smem:[#allocation13_spill]] }
 0x260   : > { %s1442_s20 = sld [smem:[#allocation15_spill]] }
 0x264   : > { %p21_p13 = scmp.ge.s32.totalorder %s1440_s21, 5  }
 0x265   : > { %s1444_s19 = smov %s1441_s25 }
 0x266   :  { %23 = sbr.rel (!%p21_p13) target bundleno = 10 (0xa), region = 109 }
 0x26b   :  { %659 = vsyncpa [#allocation3], 1 }
 0x26c   :  { %661 = vsyncpa [#allocation3 + $0x1], 1 }
 0x26d   :  { %662 = vsyncpa [#allocation6], 1 }
 0x26e   :  { %664 = vsyncpa [#allocation6 + $0x1], 1 }
 0x26f   :  { %665 = vsyncpa [#allocation4], 1 }
 0x270   :  { %667 = vsyncpa [#allocation4 + $0x1], 1 }

</bundles_post_ra>
